<compile_context>
chip_gen: v6e
topology: v6e:2x2x1
jax: 0.10.0
libtpu: 0.0.40
codegen_flags: <defaults>
</compile_context>

<pallas_src>
import jax
import jax.numpy as jnp
from jax.experimental import pallas as pl
from jax.experimental.pallas import tpu as pltpu

N_IN = 4
HIDDEN = 64
N_OUT = 2
N_OUT_PAD = 128  # lane-dense padded output width


def mlp_kernel(x_ref, w1_ref, b1_ref, w2_ref, b2_ref, o_ref):
    # x tile: (TB, 4) f32.  Weights arrive as bf16; biases as f32.
    x = x_ref[...]
    # Linear(4, 64): bf16 operands on the MXU, f32 accumulation.
    h = jnp.dot(x.astype(jnp.bfloat16), w1_ref[...],
                preferred_element_type=jnp.float32)
    # Bias + ReLU in f32 on the VPU (v5e-friendly; v6e/v7x don't care).
    h = jnp.maximum(h + b1_ref[...], 0.0)
    # Linear(64, 128-padded): bf16 operands, f32 accumulation.
    y = jnp.dot(h.astype(jnp.bfloat16), w2_ref[...],
                preferred_element_type=jnp.float32)
    # Lane-dense (TB, 128) store — unmasked vst.
    o_ref[...] = (y + b2_ref[...]).astype(o_ref.dtype)


def _round_up(n, m):
    return (n + m - 1) // m * m


def net_forward(x, w1, b1, w2, b2, *, tb=1024):
    """x: (B, 4) f32 -> (B, 2) f32.

    w1: (4, 64), b1: (1, 64), w2: (64, 2), b2: (1, 2)  (PyTorch weights
    stored transposed so the kernel computes y = x @ W + b directly).
    """
    B = x.shape[0]
    out_dtype = x.dtype

    # --- lane-dense output: pad the N=2 output dim to 128 with zero cols ---
    w2p = jnp.zeros((HIDDEN, N_OUT_PAD), jnp.float32).at[:, :N_OUT].set(w2)
    b2p = jnp.zeros((1, N_OUT_PAD), jnp.float32).at[:, :N_OUT].set(b2)

    # --- bf16 MXU operands (accumulation stays f32 inside the kernel) ---
    w1_bf = w1.astype(jnp.bfloat16)
    w2_bf = w2p.astype(jnp.bfloat16)

    # --- batch tiling: tile must be a multiple of 8 sublanes ---
    tb = max(8, min(tb, _round_up(B, 8)))
    bp = _round_up(B, tb)
    if bp != B:
        x = jnp.pad(x, ((0, bp - B), (0, 0)))
    grid = (bp // tb,)

    out = pl.pallas_call(
        mlp_kernel,
        out_shape=jax.ShapeDtypeStruct((bp, N_OUT_PAD), jnp.float32),
        grid=grid,
        in_specs=[
            pl.BlockSpec((tb, N_IN), lambda i: (i, 0)),          # x tile
            pl.BlockSpec((N_IN, HIDDEN), lambda i: (0, 0)),       # w1 (whole)
            pl.BlockSpec((1, HIDDEN), lambda i: (0, 0)),          # b1 (whole)
            pl.BlockSpec((HIDDEN, N_OUT_PAD), lambda i: (0, 0)),  # w2 padded
            pl.BlockSpec((1, N_OUT_PAD), lambda i: (0, 0)),       # b2 padded
        ],
        out_specs=pl.BlockSpec((tb, N_OUT_PAD), lambda i: (i, 0)),
        compiler_params=pltpu.CompilerParams(
            # Batch rows are independent: shard across TensorCores on v7x.
            dimension_semantics=("parallel",),
        ),
    )(x, w1_bf, b1, w2_bf, b2p)

    # Drop batch padding and the zero-padded output columns.
    return out[:B, :N_OUT].astype(out_dtype)


def init_params(key):
    """Deterministic init matching PyTorch nn.Linear shapes/defaults.
    l1: Linear(4, 64)  -> W1 (4, 64) [transposed], b1 (1, 64)
    l2: Linear(64, 2)  -> W2 (64, 2) [transposed], b2 (1, 2)
    U(-1/sqrt(fan_in), 1/sqrt(fan_in)), like PyTorch's default init.
    """
    k1, k2, k3, k4 = jax.random.split(key, 4)
    bound1 = 1.0 / jnp.sqrt(4.0)
    bound2 = 1.0 / jnp.sqrt(64.0)
    w1 = jax.random.uniform(k1, (N_IN, HIDDEN), jnp.float32, -bound1, bound1)
    b1 = jax.random.uniform(k2, (1, HIDDEN), jnp.float32, -bound1, bound1)
    w2 = jax.random.uniform(k3, (HIDDEN, N_OUT), jnp.float32, -bound2, bound2)
    b2 = jax.random.uniform(k4, (1, N_OUT), jnp.float32, -bound2, bound2)
    return w1, b1, w2, b2


def reference_forward(x, w1, b1, w2, b2):
    """Reference with the same bf16-operand / f32-accumulate scheme as the kernel."""
    h = jnp.dot(x.astype(jnp.bfloat16), w1.astype(jnp.bfloat16),
                preferred_element_type=jnp.float32)
    h = jnp.maximum(h + b1, 0.0)
    y = jnp.dot(h.astype(jnp.bfloat16), w2.astype(jnp.bfloat16),
                preferred_element_type=jnp.float32)
    return y + b2


if __name__ == "__main__":
    key = jax.random.PRNGKey(0)
    kx, kp = jax.random.split(key)
    w1, b1, w2, b2 = init_params(kp)

    # Small batch consistent with the module (in_features = 4).
    B = 8
    x = jax.random.normal(kx, (B, N_IN), jnp.float32)
    out = jax.block_until_ready(net_forward(x, w1, b1, w2, b2))
    ref = reference_forward(x, w1, b1, w2, b2)
    assert out.shape == (B, N_OUT), out.shape
    assert jnp.allclose(out, ref, atol=1e-3, rtol=1e-3), "mismatch vs reference"

    # Also exercise the batch-padding path (B not a multiple of 8).
    B2 = 5
    x2 = jax.random.normal(kx, (B2, N_IN), jnp.float32)
    out2 = jax.block_until_ready(net_forward(x2, w1, b1, w2, b2))
    ref2 = reference_forward(x2, w1, b1, w2, b2)
    assert out2.shape == (B2, N_OUT), out2.shape
    assert jnp.allclose(out2, ref2, atol=1e-3, rtol=1e-3), "mismatch (padded batch)"

    print("KERNEL_OK")
</pallas_src>

<mosaic_0001>
module attributes {stable_mosaic.version = 11 : i64} {
  func.func @mlp_kernel(%arg0: i32, %arg1: memref<8x4xf32, #tpu.memory_space<vmem>>, %arg2: memref<4x64xbf16, #tpu.memory_space<vmem>>, %arg3: memref<1x64xf32, #tpu.memory_space<vmem>>, %arg4: memref<64x128xbf16, #tpu.memory_space<vmem>>, %arg5: memref<1x128xf32, #tpu.memory_space<vmem>>, %arg6: memref<8x128xf32, #tpu.memory_space<vmem>>) attributes {dimension_semantics = [#tpu.dimension_semantics<parallel>], iteration_bounds = array<i64: 1>, scalar_prefetch = 0 : i64, scratch_operands = 0 : i64, tpu.core_type = #tpu.core_type<tc>, window_params = [{transform_indices = @transform_0, window_bounds = array<i64: 8, 4>}, {pipeline_mode = #tpu.pipeline_mode<synchronous>, transform_indices = @transform_1, window_bounds = array<i64: 4, 64>}, {pipeline_mode = #tpu.pipeline_mode<synchronous>, transform_indices = @transform_2, window_bounds = array<i64: 1, 64>}, {pipeline_mode = #tpu.pipeline_mode<synchronous>, transform_indices = @transform_3, window_bounds = array<i64: 64, 128>}, {pipeline_mode = #tpu.pipeline_mode<synchronous>, transform_indices = @transform_4, window_bounds = array<i64: 1, 128>}, {transform_indices = @transform_5, window_bounds = array<i64: 8, 128>}]} {
    %c0 = arith.constant 0 : index
    %c0_0 = arith.constant 0 : index
    %0 = vector.load %arg1[%c0, %c0_0] : memref<8x4xf32, #tpu.memory_space<vmem>>, vector<8x4xf32>
    %1 = arith.truncf %0 : vector<8x4xf32> to vector<8x4xbf16>
    %c0_1 = arith.constant 0 : index
    %c0_2 = arith.constant 0 : index
    %2 = vector.load %arg2[%c0_1, %c0_2] : memref<4x64xbf16, #tpu.memory_space<vmem>>, vector<4x64xbf16>
    %cst = arith.constant dense<0.000000e+00> : vector<8x64xf32>
    %3 = tpu.matmul %1, %2, %cst {dimension_numbers = #tpu.dot_dimension_numbers<[1], [0], [0], [1], [0, 0, 1, 1], [], []>} : vector<8x4xbf16>, vector<4x64xbf16>, vector<8x64xf32> -> vector<8x64xf32>
    %c0_3 = arith.constant 0 : index
    %c0_4 = arith.constant 0 : index
    %4 = vector.load %arg3[%c0_3, %c0_4] : memref<1x64xf32, #tpu.memory_space<vmem>>, vector<1x64xf32>
    %5 = vector.broadcast %4 : vector<1x64xf32> to vector<8x64xf32>
    %6 = arith.addf %3, %5 : vector<8x64xf32>
    %cst_5 = arith.constant 0.000000e+00 : f32
    %7 = vector.broadcast %cst_5 : f32 to vector<8x64xf32>
    %8 = arith.maximumf %6, %7 : vector<8x64xf32>
    %9 = arith.truncf %8 : vector<8x64xf32> to vector<8x64xbf16>
    %c0_6 = arith.constant 0 : index
    %c0_7 = arith.constant 0 : index
    %10 = vector.load %arg4[%c0_6, %c0_7] : memref<64x128xbf16, #tpu.memory_space<vmem>>, vector<64x128xbf16>
    %cst_8 = arith.constant dense<0.000000e+00> : vector<8x128xf32>
    %11 = tpu.matmul %9, %10, %cst_8 {dimension_numbers = #tpu.dot_dimension_numbers<[1], [0], [0], [1], [0, 0, 1, 1], [], []>} : vector<8x64xbf16>, vector<64x128xbf16>, vector<8x128xf32> -> vector<8x128xf32>
    %c0_9 = arith.constant 0 : index
    %c0_10 = arith.constant 0 : index
    %12 = vector.load %arg5[%c0_9, %c0_10] : memref<1x128xf32, #tpu.memory_space<vmem>>, vector<1x128xf32>
    %13 = vector.broadcast %12 : vector<1x128xf32> to vector<8x128xf32>
    %14 = arith.addf %11, %13 : vector<8x128xf32>
    %c0_11 = arith.constant 0 : index
    %c0_12 = arith.constant 0 : index
    %15 = vector.load %arg6[%c0_11, %c0_12] : memref<8x128xf32, #tpu.memory_space<vmem>>, vector<8x128xf32>
    tpu.vector_store %arg6[%c0_11, %c0_12], %14 {strides = array<i32>} : memref<8x128xf32, #tpu.memory_space<vmem>>, vector<8x128xf32>,
    return
  }
  func.func @transform_0(%arg0: i32) -> (i32, i32) {
    %c0_i32 = arith.constant 0 : i32
    %c0_i32_0 = arith.constant 0 : i32
    return %arg0, %c0_i32 : i32, i32
  }
  func.func @transform_1(%arg0: i32) -> (i32, i32) {
    %c0_i32 = arith.constant 0 : i32
    %c0_i32_0 = arith.constant 0 : i32
    %c0_i32_1 = arith.constant 0 : i32
    return %c0_i32, %c0_i32_0 : i32, i32
  }
  func.func @transform_2(%arg0: i32) -> (i32, i32) {
    %c0_i32 = arith.constant 0 : i32
    %c0_i32_0 = arith.constant 0 : i32
    %c0_i32_1 = arith.constant 0 : i32
    return %c0_i32, %c0_i32_0 : i32, i32
  }
  func.func @transform_3(%arg0: i32) -> (i32, i32) {
    %c0_i32 = arith.constant 0 : i32
    %c0_i32_0 = arith.constant 0 : i32
    %c0_i32_1 = arith.constant 0 : i32
    return %c0_i32, %c0_i32_0 : i32, i32
  }
  func.func @transform_4(%arg0: i32) -> (i32, i32) {
    %c0_i32 = arith.constant 0 : i32
    %c0_i32_0 = arith.constant 0 : i32
    %c0_i32_1 = arith.constant 0 : i32
    return %c0_i32, %c0_i32_0 : i32, i32
  }
  func.func @transform_5(%arg0: i32) -> (i32, i32) {
    %c0_i32 = arith.constant 0 : i32
    %c0_i32_0 = arith.constant 0 : i32
    return %arg0, %c0_i32 : i32, i32
  }
}

</mosaic_0001>

<bundles_post_ra>
// kernel: tpu_custom_call.1
= control target key start
LH: loop header
LB: loop body
LE: loop exit
PB: predicated region body
PF: predicated region fallthrough
CT: control target
= control target key end

     0   :  { %10 = vsyncpa [#allocation3], 0  ;;  %s336_s0 = inlined_call_operand.vmem [shape: f32[8,4], index: 0, kind: input, shape index: {}]   ;;  %s337_s1 = inlined_call_operand.vmem [shape: bf16[4,64], index: 1, kind: input, shape index: {}]   ;;  %s338_s2 = inlined_call_operand.vmem [shape: f32[1,64], index: 2, kind: input, shape index: {}]   ;;  %s339_s3 = inlined_call_operand.hbm [shape: bf16[64,128], index: 3, kind: input, shape index: {}]   ;;  %s340_s4 = inlined_call_operand.vmem [shape: f32[1,128], index: 4, kind: input, shape index: {}]   ;;  %s341_s5 = inlined_call_operand.hbm [shape: f32[8,128], index: 5, kind: output, shape index: {}]  }
   0x1   :  { %11 = vsyncpa [#allocation4], 0  ;;  %s282_s18 = smov [#allocation2]  }
   0x2   :  { %s23_s19 = sshll.u32 %s282_s18, 4  ;;  %s24_s19 = int_to_ptr.vmem [resolvable:$true] %s23_s19 }
   0x3   :  { %s246_s20 = scalar_lea.vmem %s24_s19, 512  ;;  %p251_p1 = scmp.lt.s32.totalorder %s24_s19, %s24_s19 }
   0x4   :  { %p247_p0 = scmp.ne.s32.totalorder %s24_s19, %s246_s20  ;;  %p252_p2 = scmp.lt.s32.totalorder %s246_s20, %s246_s20 }
   0x6   :  { %p253_p3 = por %p252_p2, %p251_p1 }
   0x8   :  { %p254_p4 = pnand %p253_p3, %p247_p0 }
   0xa   :  { %257 = shalt.err (!%p254_p4)
}
   0xb   :  { %s283_s21 = smov 64   ;;  %s284_s22 = smov 4  }
   0xc   :  { %29 = dma.hbm_to_vmem [thread:$0]  %s339_s3, 512, %s24_s19, [#allocation3], %s283_s21, %s283_s21, %s284_s22  }
   0xd   :  { %278 = dma.done.wait [#allocation3], 512  }
   0xe   :  { %279 = vsyncadd [#allocation3], 4294966784  ;;  %v285_v0 = vmov 0.0   ;;  %vm286_vm0 = vmmov 0   ;;  %vm50_vm1 = vcmask 1041408   ;;  %v36_v2 = vld [vmem:[%s336_s0] sm:$0xff] }
   0xf   :  { %210 = vmatprep.subr.bf16.mxu0 %v285_v0  ;;  %212 = vmatprep.mubr.msk.bf16.mxu0 %vm286_vm0, %v285_v0  ;;  %v38_v1 = vld [vmem:[%s337_s1] sm:$0x3]  ;;  %v37_v4 = vpack.c.bf16 %v36_v2, %v36_v2  ;;  %v234_v5 = vld [vmem:[#allocation2 + $0x18] sm:$0xff]   ;;  %vm46_vm2 = vcmask 31744   ;;  %v235_v6 = vld [vmem:[#allocation2 + $0x10] sm:$0xff]   ;;  %vm135_vm3 = vcmask 523264  }
  0x10   :  { %216 = vmatprep.subr.bf16.mxu1 %v285_v0  ;;  %224 = vmatprep.mubr.msk.bf16.mxu1 %vm286_vm0, %v285_v0  ;;  %v52_v3 = vsel %vm50_vm1, %v38_v1, 0  ;;  %v236_v7 = vld [vmem:[#allocation2 + $0x8] sm:$0xff]   ;;  %v237_v8 = vld [vmem:[#allocation2] sm:$0xff]   ;;  %s287_s30 = smov [#allocation5]  }
  0x11   :  { %211 = vmatpush3.bf16.msra.mxu0 %v52_v3  ;;  %217 = vmatpush3.bf16.msra.mxu1 %v234_v5  ;;  %v195_v9 = vld [vmem:[%s338_s2] ss:$0 sm:$0xff]  ;;  %s186_s6 = sshll.u32 %s287_s30, 4  ;;  %s187_s6 = int_to_ptr.vmem [resolvable:$true] %s186_s6 }
  0x12   :  { %218 = vmatprep.subr.bf16.mxu1 %v285_v0  ;;  %v197_v17 = vld [vmem:[%s340_s4] ss:$0 sm:$0xff]  ;;  %s258_s2 = scalar_lea.vmem %s187_s6, 128  ;;  %p263_p6 = scmp.lt.s32.totalorder %s187_s6, %s187_s6 }
  0x13   :  { %p259_p5 = scmp.ne.s32.totalorder %s187_s6, %s258_s2  ;;  %p264_p7 = scmp.lt.s32.totalorder %s258_s2, %s258_s2 }
  0x14   :  { %213 = vmatmul.mubr.msk.bf16.vlgmr.msra.gmra.mxu0 %vm46_vm2, %v37_v4 }
  0x15   :  { %219 = vmatpush3.bf16.msra.mxu1 %v235_v6  ;;  %p265_p8 = por %p264_p7, %p263_p6 }
  0x16   :  { %220 = vmatprep.subr.bf16.mxu1 %v285_v0 }
  0x17   :  { %p266_p9 = pnand %p265_p8, %p259_p5 }
  0x19   :  { %221 = vmatpush3.bf16.msra.mxu1 %v236_v7 }
  0x1a   :  { %222 = vmatprep.subr.bf16.mxu1 %v285_v0 }
  0x1d   :  { %223 = vmatpush3.bf16.msra.mxu1 %v237_v8 }
  0xd4   :  { %v88_v10 = vpop.f32.mrf.mxu0 }
  0xd5   :  { %v89_v11 = vadd.f32 %v195_v9, %v88_v10 }
  0xd6   :  { %v214_v12 = vpop.f32.mrf.mxu0 }
  0xd7   :  { %v94_v13 = vmax.f32 %v89_v11, 0.0 }
  0xd8   :  { %v91_v14 = vpop.f32.mrf.mxu0 }
  0xd9   :  { %v95_v15 = vpack.c.bf16 %v94_v13, %v94_v13 }
  0xda   :  { %v215_v16 = vpop.f32.mrf.mxu0 }
  0xdb   :  { %225 = vmatmul.mubr.msk.bf16.vlgmr.msra.gmra.mxu1 %vm135_vm3, %v95_v15 }
 0x19b   :  { %v173_v18 = vpop.f32.mrf.mxu1 }
 0x19c   :  { %v174_v19 = vadd.f32 %v197_v17, %v173_v18 }
 0x19d   :  { %v226_v20 = vpop.f32.mrf.mxu1 }
 0x19e   :  { %179 = vst [vmem:[#allocation5] sm:$0xff] %v174_v19 }
 0x19f   :  { %v176_v21 = vpop.f32.mrf.mxu1 }
 0x1a0   :  { %269 = shalt.err (!%p266_p9)
}
 0x1a1   :  { %189 = dma.vmem_to_hbm [thread:$0]  %s187_s6, 128, %s341_s5, [#allocation4]   ;;  %v227_v22 = vpop.f32.mrf.mxu1 }
 0x1a2   :  { %280 = dma.done.wait [#allocation4], 128  }
 0x1a3   :  { %281 = vsyncadd [#allocation4], 4294967168 }
 0x1a4   :  { %193 = vsyncpa [#allocation3], 1 }
 0x1a5   :  { %194 = vsyncpa [#allocation4], 1 }

</bundles_post_ra>
